<compile_context>
chip_gen: v7x
topology: tpu7x:2x2x1
jax: 0.10.0
libtpu: 0.0.40
codegen_flags: <defaults>
</compile_context>

<pallas_src>
import functools

import jax
import jax.numpy as jnp
from jax.experimental import pallas as pl
from jax.experimental.pallas import tpu as pltpu

LANE = 128


def _vmem_budget(*buffer_bytes):
    # Double-buffered streamed tiles + headroom for weights/gates/scratch/sems.
    return int(sum(2 * b for b in buffer_bytes) + (8 << 20))


def _squeeze_excite_kernel(x_ref, w1_ref, w2_ref, s_ref, acc_ref, *, hw_true):
    # x_ref : (Nt, C, HW_TILE)   input tile (native dtype)
    # w1_ref: (C, Cr), w2_ref: (Cr, C)   resident weights (constant index maps)
    # s_ref : (Nt, C)            excitation gates output (f32)
    # acc_ref: (Nt, C, LANE)     f32 partial-sum scratch, resident across HW axis
    hw = pl.program_id(1)

    @pl.when(hw == 0)
    def _():
        acc_ref[...] = jnp.zeros_like(acc_ref)

    x = x_ref[...]
    hw_tile = x.shape[-1]
    # Two-stage reduction: combine aligned 128-lane groups with cheap VPU adds,
    # accumulate into the lane-shaped scratch (f32), defer the single
    # cross-lane (XLU) reduce to the finalize step.
    partial = x[..., 0:LANE].astype(jnp.float32)
    for g in range(1, hw_tile // LANE):
        partial = partial + x[..., g * LANE:(g + 1) * LANE].astype(jnp.float32)
    acc_ref[...] += partial

    @pl.when(hw == pl.num_programs(1) - 1)
    def _():
        # One 128-lane reduce per (n, c) row, then the tiny excitation MLP.
        y = jnp.sum(acc_ref[...], axis=-1) * (1.0 / hw_true)              # (Nt, C)
        h = jnp.dot(y, w1_ref[...].astype(jnp.float32),
                    preferred_element_type=jnp.float32)                   # (Nt, Cr)
        h = jnp.maximum(h, 0.0)
        s = jnp.dot(h, w2_ref[...].astype(jnp.float32),
                    preferred_element_type=jnp.float32)                   # (Nt, C)
        s_ref[...] = jax.nn.sigmoid(s).astype(s_ref.dtype)


def _scale_kernel(x_ref, s_ref, o_ref):
    # x_ref: (Nt, C, HW_TILE); s_ref: (Nt, C) gates; o_ref: (Nt, C, HW_TILE)
    # Broadcast-multiply in the input's native dtype (gates cast down once).
    # TODO(synk): on v5e (no bf16 VALU) a bf16 input would prefer an f32 multiply.
    s = s_ref[...].astype(o_ref.dtype)
    o_ref[...] = x_ref[...] * s[:, :, None]


def se_block(x, w1, w2, *, hw_tile_target=512, n_tile_target=8):
    """SE block forward.

    x : (N, C, H, W)  NCHW input.
    w1: (C//r, C)     first Linear weight (PyTorch layout, bias-free).
    w2: (C, C//r)     second Linear weight (PyTorch layout, bias-free).
    """
    N, C, H, W = x.shape
    HW = H * W
    Cr = w1.shape[0]

    w1t = jnp.transpose(w1)  # (C, Cr)
    w2t = jnp.transpose(w2)  # (Cr, C)

    # Batch tile: multiple of 8 sublanes when possible, else the full batch.
    n_tile = n_tile_target if (N % n_tile_target == 0) else N
    n_grid = N // n_tile

    # Lane-dense HW tiling: tile width a multiple of 128, pad HW up to fit.
    hw_tile_target = max(LANE, (hw_tile_target // LANE) * LANE)
    hw_pad = -(-HW // LANE) * LANE
    hw_tile = min(hw_tile_target, hw_pad)
    hw_pad = -(-hw_pad // hw_tile) * hw_tile
    hw_grid = hw_pad // hw_tile

    x_flat = x.reshape(N, C, HW)
    if hw_pad != HW:
        x_flat = jnp.pad(x_flat, ((0, 0), (0, 0), (0, hw_pad - HW)))

    itemsize = jnp.dtype(x.dtype).itemsize
    tile_bytes = n_tile * C * hw_tile * itemsize

    # ---- Pass 1: squeeze (spatial mean) + excitation MLP -> gates (N, C) ----
    gates = pl.pallas_call(
        functools.partial(_squeeze_excite_kernel, hw_true=HW),
        out_shape=jax.ShapeDtypeStruct((N, C), jnp.float32),
        grid_spec=pltpu.PrefetchScalarGridSpec(
            num_scalar_prefetch=0,
            grid=(n_grid, hw_grid),                       # reduction axis last
            in_specs=[
                pl.BlockSpec((n_tile, C, hw_tile), lambda i, j: (i, 0, j)),
                pl.BlockSpec((C, Cr), lambda i, j: (0, 0)),   # resident weights
                pl.BlockSpec((Cr, C), lambda i, j: (0, 0)),
            ],
            out_specs=pl.BlockSpec((n_tile, C), lambda i, j: (i, 0)),
            scratch_shapes=[pltpu.VMEM((n_tile, C, LANE), jnp.float32)],
        ),
        compiler_params=pltpu.CompilerParams(
            dimension_semantics=("parallel", "arbitrary"),
            vmem_limit_bytes=_vmem_budget(tile_bytes),
        ),
        cost_estimate=pl.CostEstimate(
            flops=N * C * hw_pad + 4 * N * C * Cr,
            transcendentals=N * C,
            bytes_accessed=N * C * hw_pad * itemsize + N * C * 4,
        ),
    )(x_flat, w1t, w2t)

    # ---- Pass 2: broadcast-multiply x by the gates (pure streaming) ----
    out_flat = pl.pallas_call(
        _scale_kernel,
        out_shape=jax.ShapeDtypeStruct((N, C, hw_pad), x.dtype),
        grid_spec=pltpu.PrefetchScalarGridSpec(
            num_scalar_prefetch=0,
            grid=(n_grid, hw_grid),
            in_specs=[
                pl.BlockSpec((n_tile, C, hw_tile), lambda i, j: (i, 0, j)),
                pl.BlockSpec((n_tile, C), lambda i, j: (i, 0)),
            ],
            out_specs=pl.BlockSpec((n_tile, C, hw_tile), lambda i, j: (i, 0, j)),
        ),
        compiler_params=pltpu.CompilerParams(
            dimension_semantics=("parallel", "parallel"),
            vmem_limit_bytes=_vmem_budget(tile_bytes, tile_bytes),
        ),
        cost_estimate=pl.CostEstimate(
            flops=N * C * hw_pad,
            transcendentals=0,
            bytes_accessed=2 * N * C * hw_pad * itemsize + N * C * 4,
        ),
    )(x_flat, gates)

    if hw_pad != HW:
        out_flat = out_flat[..., :HW]
    return out_flat.reshape(N, C, H, W)


def se_block_reference(x, w1, w2):
    """Pure-JAX reference matching the PyTorch forward."""
    y = jnp.mean(x.astype(jnp.float32), axis=(2, 3))           # (N, C)
    y = jnp.maximum(y @ w1.T.astype(jnp.float32), 0.0)         # (N, C//r)
    y = jax.nn.sigmoid(y @ w2.T.astype(jnp.float32))           # (N, C)
    return (x.astype(jnp.float32) * y[:, :, None, None]).astype(x.dtype)


if __name__ == "__main__":
    # Small shapes consistent with the module: C must be divisible by r=16.
    # H*W = 1024 exercises multiple HW grid steps (accumulator path).
    N, C, H, W = 2, 64, 32, 32
    r = 16
    Cr = C // r

    key = jax.random.PRNGKey(0)
    kx, k1, k2 = jax.random.split(key, 3)
    x = jax.random.normal(kx, (N, C, H, W), dtype=jnp.float32)
    # Deterministic synthetic weights (PyTorch Linear weight shapes):
    w1 = jax.random.normal(k1, (Cr, C), dtype=jnp.float32) * (1.0 / jnp.sqrt(C))
    w2 = jax.random.normal(k2, (C, Cr), dtype=jnp.float32) * (1.0 / jnp.sqrt(Cr))

    out = jax.block_until_ready(se_block(x, w1, w2))

    ref = se_block_reference(x, w1, w2)
    assert out.shape == (N, C, H, W)
    assert jnp.allclose(out, ref, atol=1e-5, rtol=1e-5), "mismatch vs reference"

    print("KERNEL_OK")
</pallas_src>

<mosaic_0001>
module attributes {stable_mosaic.version = 11 : i64} {
  func.func @_squeeze_excite_kernel(%arg0: i32, %arg1: i32, %arg2: memref<2x64x512xf32, #tpu.memory_space<vmem>>, %arg3: memref<64x4xf32, #tpu.memory_space<vmem>>, %arg4: memref<4x64xf32, #tpu.memory_space<vmem>>, %arg5: memref<2x64xf32, #tpu.memory_space<vmem>>, %arg6: memref<2x64x128xf32, #tpu.memory_space<vmem>>) attributes {dimension_semantics = [#tpu.dimension_semantics<parallel>, #tpu.dimension_semantics<arbitrary>], iteration_bounds = array<i64: 1, 2>, scalar_prefetch = 0 : i64, scratch_operands = 1 : i64, tpu.core_type = #tpu.core_type<tc>, window_params = [{transform_indices = @transform_0, window_bounds = array<i64: 2, 64, 512>}, {pipeline_mode = #tpu.pipeline_mode<synchronous>, transform_indices = @transform_1, window_bounds = array<i64: 64, 4>}, {pipeline_mode = #tpu.pipeline_mode<synchronous>, transform_indices = @transform_2, window_bounds = array<i64: 4, 64>}, {transform_indices = @transform_3, window_bounds = array<i64: 2, 64>}]} {
    %c0_i32 = arith.constant 0 : i32
    %0 = arith.cmpi eq, %arg1, %c0_i32 : i32
    %1 = arith.extui %0 : i1 to i32
    %c0_i32_0 = arith.constant 0 : i32
    %2 = arith.cmpi ne, %1, %c0_i32_0 : i32
    scf.if %2 {
      %cst = arith.constant 0.000000e+00 : f32
      %17 = vector.broadcast %cst : f32 to vector<2x64x128xf32>
      %c0_10 = arith.constant 0 : index
      %c0_11 = arith.constant 0 : index
      %c0_12 = arith.constant 0 : index
      %18 = vector.load %arg6[%c0_10, %c0_11, %c0_12] : memref<2x64x128xf32, #tpu.memory_space<vmem>>, vector<2x64x128xf32>
      tpu.vector_store %arg6[%c0_10, %c0_11, %c0_12], %17 {strides = array<i32>} : memref<2x64x128xf32, #tpu.memory_space<vmem>>, vector<2x64x128xf32>,
    } else {
    }
    %c0 = arith.constant 0 : index
    %c0_1 = arith.constant 0 : index
    %c0_2 = arith.constant 0 : index
    %3 = vector.load %arg2[%c0, %c0_1, %c0_2] : memref<2x64x512xf32, #tpu.memory_space<vmem>>, vector<2x64x512xf32>
    %4 = vector.extract_strided_slice %3 {offsets = [0, 0, 0], sizes = [2, 64, 128], strides = [1, 1, 1]} : vector<2x64x512xf32> to vector<2x64x128xf32>
    %5 = vector.extract_strided_slice %3 {offsets = [0, 0, 128], sizes = [2, 64, 128], strides = [1, 1, 1]} : vector<2x64x512xf32> to vector<2x64x128xf32>
    %6 = arith.addf %4, %5 : vector<2x64x128xf32>
    %7 = vector.extract_strided_slice %3 {offsets = [0, 0, 256], sizes = [2, 64, 128], strides = [1, 1, 1]} : vector<2x64x512xf32> to vector<2x64x128xf32>
    %8 = arith.addf %6, %7 : vector<2x64x128xf32>
    %9 = vector.extract_strided_slice %3 {offsets = [0, 0, 384], sizes = [2, 64, 128], strides = [1, 1, 1]} : vector<2x64x512xf32> to vector<2x64x128xf32>
    %10 = arith.addf %8, %9 : vector<2x64x128xf32>
    %c0_3 = arith.constant 0 : index
    %c0_4 = arith.constant 0 : index
    %c0_5 = arith.constant 0 : index
    %11 = vector.load %arg6[%c0_3, %c0_4, %c0_5] : memref<2x64x128xf32, #tpu.memory_space<vmem>>, vector<2x64x128xf32>
    %12 = arith.addf %11, %10 : vector<2x64x128xf32>
    %c0_6 = arith.constant 0 : index
    %c0_7 = arith.constant 0 : index
    %c0_8 = arith.constant 0 : index
    %13 = vector.load %arg6[%c0_6, %c0_7, %c0_8] : memref<2x64x128xf32, #tpu.memory_space<vmem>>, vector<2x64x128xf32>
    tpu.vector_store %arg6[%c0_6, %c0_7, %c0_8], %12 {strides = array<i32>} : memref<2x64x128xf32, #tpu.memory_space<vmem>>, vector<2x64x128xf32>,
    %c1_i32 = arith.constant 1 : i32
    %14 = arith.cmpi eq, %arg1, %c1_i32 : i32
    %15 = arith.extui %14 : i1 to i32
    %c0_i32_9 = arith.constant 0 : i32
    %16 = arith.cmpi ne, %15, %c0_i32_9 : i32
    scf.if %16 {
      %c0_10 = arith.constant 0 : index
      %c0_11 = arith.constant 0 : index
      %c0_12 = arith.constant 0 : index
      %17 = vector.load %arg6[%c0_10, %c0_11, %c0_12] : memref<2x64x128xf32, #tpu.memory_space<vmem>>, vector<2x64x128xf32>
      %cst = arith.constant dense<0.000000e+00> : vector<2x64xf32>
      %18 = vector.multi_reduction <add>, %17, %cst [2] : vector<2x64x128xf32> to vector<2x64xf32>
      %cst_13 = arith.constant 9.765625E-4 : f32
      %19 = vector.broadcast %cst_13 : f32 to vector<2x64xf32>
      %20 = arith.mulf %18, %19 : vector<2x64xf32>
      %c0_14 = arith.constant 0 : index
      %c0_15 = arith.constant 0 : index
      %21 = vector.load %arg3[%c0_14, %c0_15] : memref<64x4xf32, #tpu.memory_space<vmem>>, vector<64x4xf32>
      %cst_16 = arith.constant dense<0.000000e+00> : vector<2x4xf32>
      %22 = tpu.matmul %20, %21, %cst_16 {dimension_numbers = #tpu.dot_dimension_numbers<[1], [0], [0], [1], [0, 0, 1, 1], [], []>} : vector<2x64xf32>, vector<64x4xf32>, vector<2x4xf32> -> vector<2x4xf32>
      %cst_17 = arith.constant 0.000000e+00 : f32
      %23 = vector.broadcast %cst_17 : f32 to vector<2x4xf32>
      %24 = arith.maximumf %22, %23 : vector<2x4xf32>
      %c0_18 = arith.constant 0 : index
      %c0_19 = arith.constant 0 : index
      %25 = vector.load %arg4[%c0_18, %c0_19] : memref<4x64xf32, #tpu.memory_space<vmem>>, vector<4x64xf32>
      %cst_20 = arith.constant dense<0.000000e+00> : vector<2x64xf32>
      %26 = tpu.matmul %24, %25, %cst_20 {dimension_numbers = #tpu.dot_dimension_numbers<[1], [0], [0], [1], [0, 0, 1, 1], [], []>} : vector<2x4xf32>, vector<4x64xf32>, vector<2x64xf32> -> vector<2x64xf32>
      %27 = arith.negf %26 : vector<2x64xf32>
      %28 = math.exp %27 : vector<2x64xf32>
      %cst_21 = arith.constant 1.000000e+00 : f32
      %29 = vector.broadcast %cst_21 : f32 to vector<2x64xf32>
      %30 = arith.addf %29, %28 : vector<2x64xf32>
      %31 = arith.divf %29, %30 : vector<2x64xf32>
      %c0_22 = arith.constant 0 : index
      %c0_23 = arith.constant 0 : index
      %32 = vector.load %arg5[%c0_22, %c0_23] : memref<2x64xf32, #tpu.memory_space<vmem>>, vector<2x64xf32>
      tpu.vector_store %arg5[%c0_22, %c0_23], %31 {strides = array<i32>} : memref<2x64xf32, #tpu.memory_space<vmem>>, vector<2x64xf32>,
    } else {
    }
    return
  }
  func.func @transform_0(%arg0: i32, %arg1: i32) -> (i32, i32, i32) {
    %c0_i32 = arith.constant 0 : i32
    %c0_i32_0 = arith.constant 0 : i32
    return %arg0, %c0_i32, %arg1 : i32, i32, i32
  }
  func.func @transform_1(%arg0: i32, %arg1: i32) -> (i32, i32) {
    %c0_i32 = arith.constant 0 : i32
    %c0_i32_0 = arith.constant 0 : i32
    %c0_i32_1 = arith.constant 0 : i32
    return %c0_i32, %c0_i32_0 : i32, i32
  }
  func.func @transform_2(%arg0: i32, %arg1: i32) -> (i32, i32) {
    %c0_i32 = arith.constant 0 : i32
    %c0_i32_0 = arith.constant 0 : i32
    %c0_i32_1 = arith.constant 0 : i32
    return %c0_i32, %c0_i32_0 : i32, i32
  }
  func.func @transform_3(%arg0: i32, %arg1: i32) -> (i32, i32) {
    %c0_i32 = arith.constant 0 : i32
    %c0_i32_0 = arith.constant 0 : i32
    return %arg0, %c0_i32 : i32, i32
  }
}

</mosaic_0001>

<bundles_post_ra>
// kernel: tpu_custom_call.1
= control target key start
LH: loop header
LB: loop body
LE: loop exit
PB: predicated region body
PF: predicated region fallthrough
CT: control target
= control target key end

     0   :  { %8 = vsyncpa [#allocation4], 0  ;;  %s1341_s0 = inlined_call_operand.hbm [shape: f32[2,64,1024], index: 0, kind: input, shape index: {}]   ;;  %s1342_s1 = inlined_call_operand.vmem [shape: f32[64,4], index: 1, kind: input, shape index: {}]   ;;  %s1343_s2 = inlined_call_operand.vmem [shape: f32[4,64], index: 2, kind: input, shape index: {}]   ;;  %s1344_s3 = inlined_call_operand.hbm [shape: f32[2,64], index: 3, kind: output, shape index: {}]  }
   0x1   :  { %10 = vsyncpa [#allocation4 + $0x1], 0 }
   0x2   :  { %11 = vsyncpa [#allocation5], 0  ;;  %s1083_s12 = smov 0   ;;  %s1085_s13 = smov 0  }
   0x3   :  { %s1087_s14 = smov 0   ;;  %s1089_s15 = smov 0  }
   0x4   :  { %s1091_s16 = smov 0   ;;  %s1093_s17 = smov 0  }
   0x5 LB: > { %s803_s18 = sadd.s32 4294967295, %s1052_s17   ;;  %s26_s19 = sadd.s32 1, %s1048_s16  ;;  %s1052_s17 = sphi %s1093_s17, %s17_s17   ;;  %s1048_s16 = sphi %s1091_s16, %s1354_s16   ;;  %s1044_s15 = sphi %s1089_s15, %s1353_s15   ;;  %s1040_s14 = sphi %s1087_s14, %s1352_s14   ;;  %s1036_s13 = sphi %s1085_s13, %s1351_s13   ;;  %s1032_s12 = sphi %s1083_s12, %s1350_s12  }
   0x6   : > { %p27_p0 = scmp.ge.s32.totalorder %s26_s19, 2  ;;  %s38_s20 = sadd.s32 1, %s1040_s14 }
   0x7   : > { %p45_p1 = scmp.ne.s32.totalorder %s1040_s14, %s1036_s13  ;;  %p46_p2 = scmp.eq.s32.totalorder %s1052_s17, 0 }
   0x8   : > { %s1356_s19 = smov (%p27_p0, %s26_s19), 0  ;;  %p51_p4 = scmp.ne.s32.totalorder %s1036_s13, %s1032_s12 }
   0x9   : > { %p1119_p3 = por %p46_p2, %p45_p1  ;;  %s34_s22 = ssub.s32 %s1048_s16, %s1356_s19 }
   0xa   : > { %p52_p5 = scmp.eq.s32.totalorder %s803_s18, 0  ;;  %p36_p6 = scmp.eq.s32.totalorder %s34_s22, 0 }
   0xb   : > { %p879_p8 = scmp.lt.s32.totalorder %s1052_s17, 2  ;;  %s149_s25 = sand.u32 1, %s1040_s14  }
   0xc   : > { %p1128_p7 = por %p52_p5, %p51_p4  ;;  %s821_s26 = sshll.u32 %s1048_s16, 9 }
   0xd   : > { %s1134_s24 = scalar_select %p36_p6, %s1040_s14, %s38_s20  }
   0xe   : > { %s806_s27 = sshll.u32 %s149_s25, 9  ;;  %s1141_s30 = scalar_lea.hbm %s1341_s0, %s821_s26 }
   0xf   : > { %s153_s4 = scalar_lea.vmem [#allocation3], %s806_s27  ;;  %p1145_p9 = pnand %p879_p8, %p1119_p3 }
  0x10   : > { %s163_s5 = sshll.u32 %s153_s4, 4  ;;  %s1152_s7 = scalar_lea.sflag [#allocation4], %s149_s25  ;;  %s1149_s5 = int_to_ptr.vmem [resolvable:$true] %s163_s5 }
  0x11   : > { %s942_s8 = scalar_lea.hbm %s1141_s30, 8192  ;;  %p944_p12 = pneg %p1145_p9 }
  0x12   : > { %p943_p11 = scmp.ne.s32.totalorder %s1141_s30, %s942_s8  ;;  %s947_s11 = scalar_lea.hbm %s1341_s0, 16384 }
  0x13   : > { %p948_p1 = scmp.lt.u32.totalorder %s1141_s30, %s1341_s0  ;;  %p949_p2 = scmp.lt.u32.totalorder %s947_s11, %s942_s8 }
  0x14   : > { %p945_p13 = pnand %p944_p12, %p943_p11  ;;  %p951_p4 = scmp.lt.u32.totalorder %s942_s8, %s1141_s30 }
  0x15   : > { %p950_p3 = por %p949_p2, %p948_p1 }
  0x16   : > { %p946_p0 = pneg %p945_p13 }
  0x17   : > { %p952_p5 = por %p951_p4, %p950_p3 }
  0x19   : > { %p953_p6 = pnand %p952_p5, %p946_p0 }
  0x1b   : > { %956 = shalt.err (!%p953_p6)
}
  0x1c   : > { %s957_s21 = scalar_lea.vmem %s1149_s5, 8192  ;;  %s1054_s22 = smov [#allocation3]  }
  0x1d   : > { %p958_p8 = scmp.ne.s32.totalorder %s1149_s5, %s957_s21  ;;  %s962_s25 = sshll.u32 %s1054_s22, 4  ;;  %s963_s25 = int_to_ptr.vmem [resolvable:$false] %s962_s25 }
  0x1e   : > { %s964_s26 = scalar_lea.vmem %s963_s25, 16384  ;;  %p965_p10 = scmp.lt.s32.totalorder %s1149_s5, %s963_s25 }
  0x1f   : > { %p960_p11 = pnand %p958_p8, %p944_p12  ;;  %p966_p1 = scmp.lt.s32.totalorder %s964_s26, %s957_s21 }
  0x21   : > { %p961_p13 = pneg %p960_p11  ;;  %p967_p2 = por %p966_p1, %p965_p10 }
  0x23   : > { %p968_p3 = pnand %p967_p2, %p961_p13 }
  0x25   : > { %971 = shalt.err (!%p968_p3)
}
  0x26   : > { %s1055_s27 = smov 1024   ;;  %s1056_s28 = smov 512  }
  0x27   : > { %s1057_s29 = smov 32   ;;  %p171_p12 = scmp.lt.s32.totalorder %s1052_s17, 3 }
  0x28   : > { %878 = dma.hbm_to_vmem [thread:$0]  (!%p1145_p9), %s1141_s30, 8192, %s1149_s5, %s1152_s7, %s1055_s27, %s1056_s28, %s1057_s29  }
  0x29   : > { %p1348_p0 = scmp.ge.s32.totalorder %s1052_s17, 1 }
  0x2b   : > { %p172_p4 = pnand %p1348_p0, %p171_p12 }
  0x2c   : > { %s177_s4 = sand.u32 (!%p172_p4), 1, %s1036_s13  }
  0x2d   : > { %175 = sbr.rel (%p172_p4) target bundleno = 746 (0x2ea), region = 32  ;;  %s810_s8 = sshll.u32 (!%p172_p4), %s177_s4, 9 }
  0x2e   : > { %s178_s9 = scalar_lea.sflag (!%p172_p4), [#allocation4], %s177_s4  ;;  %s1184_s10 = scalar_lea.vmem (!%p172_p4), [#allocation3], %s810_s8 }
  0x34   : > { %1023 = dma.done.wait (%p1128_p7), %s178_s9, 8192  }
  0x35   : > { %1025 = vsyncadd (%p1128_p7), %s178_s9, 4294959104  ;;  %p811_p10 = scmp.ne.s32.totalorder %s1044_s15, 0 }
  0x36   : > { %v1058_v0 = vmov (!%p811_p10), 0.0  }
  0x37   : > { %204 = sbr.rel (%p811_p10) target bundleno = 63 (0x3f), region = 40  ;;  %205 = vst [vmem:[#allocation2] sm:$0xff] (!%p811_p10), %v1058_v0  ;;  %206 = vst [vmem:[#allocation2 + $0x8] sm:$0xff] (!%p811_p10), %v1058_v0 }
  0x38   : > { %207 = vst [vmem:[#allocation2 + $0x10] sm:$0xff] (!%p811_p10), %v1058_v0  ;;  %208 = vst [vmem:[#allocation2 + $0x18] sm:$0xff] (!%p811_p10), %v1058_v0 }
  0x39   : > { %209 = vst [vmem:[#allocation2 + $0x20] sm:$0xff] (!%p811_p10), %v1058_v0  ;;  %210 = vst [vmem:[#allocation2 + $0x28] sm:$0xff] (!%p811_p10), %v1058_v0 }
  0x3a   : > { %211 = vst [vmem:[#allocation2 + $0x30] sm:$0xff] (!%p811_p10), %v1058_v0  ;;  %212 = vst [vmem:[#allocation2 + $0x38] sm:$0xff] (!%p811_p10), %v1058_v0 }
  0x3b   : > { %213 = vst [vmem:[#allocation2 + $0x40] sm:$0xff] (!%p811_p10), %v1058_v0  ;;  %214 = vst [vmem:[#allocation2 + $0x48] sm:$0xff] (!%p811_p10), %v1058_v0 }
  0x3c   : > { %215 = vst [vmem:[#allocation2 + $0x50] sm:$0xff] (!%p811_p10), %v1058_v0  ;;  %216 = vst [vmem:[#allocation2 + $0x58] sm:$0xff] (!%p811_p10), %v1058_v0 }
  0x3d   : > { %217 = vst [vmem:[#allocation2 + $0x60] sm:$0xff] (!%p811_p10), %v1058_v0  ;;  %218 = vst [vmem:[#allocation2 + $0x68] sm:$0xff] (!%p811_p10), %v1058_v0 }
  0x3e   : > { %219 = vst [vmem:[#allocation2 + $0x70] sm:$0xff] %v1058_v0  ;;  %220 = vst [vmem:[#allocation2 + $0x78] sm:$0xff] %v1058_v0 }
  0x3f PF: > { %v221_v1 = vld [vmem:[%s1184_s10] sm:$0xff]  ;;  %v222_v2 = vld [vmem:[%s1184_s10 + $0x8] sm:$0xff]  ;;  %v223_v3 = vld [vmem:[%s1184_s10 + $0x10] sm:$0xff]  ;;  %p812_p7 = scmp.ne.s32.totalorder %s1044_s15, 1 }
  0x40   : > { %v285_v4 = vadd.f32 %v222_v2, %v221_v1  ;;  %v225_v5 = vld [vmem:[%s1184_s10 + $0x20] sm:$0xff]  ;;  %v224_v6 = vld [vmem:[%s1184_s10 + $0x18] sm:$0xff]  ;;  %v226_v7 = vld [vmem:[%s1184_s10 + $0x28] sm:$0xff]  ;;  %vm1060_vm0 = vmmov (!%p812_p7), 0   ;;  %vm484_vm1 = vcmask (!%p812_p7), 130112   ;;  %vm491_vm2 = vcmask (!%p812_p7), 195712  }
  0x41   : > { %v227_v8 = vld [vmem:[%s1184_s10 + $0x30] sm:$0xff]  ;;  %v333_v10 = vld [vmem:[#allocation2] sm:$0xff]  ;;  %v286_v11 = vadd.f32 %v226_v7, %v225_v5  ;;  %v230_v13 = vld [vmem:[%s1184_s10 + $0x48] sm:$0xff]  ;;  %vm498_vm3 = vcmask (!%p812_p7), 261312   ;;  %vm505_vm4 = vcmask (!%p812_p7), 326912   ;;  %vm512_vm5 = vcmask (!%p812_p7), 392512  }
  0x42   : > { %v301_v9 = vadd.f32 %v285_v4, %v223_v3  ;;  %v229_v12 = vld [vmem:[%s1184_s10 + $0x40] sm:$0xff]  ;;  %v228_v14 = vld [vmem:[%s1184_s10 + $0x38] sm:$0xff]  ;;  %v231_v15 = vld [vmem:[%s1184_s10 + $0x50] sm:$0xff]  ;;  %vm519_vm6 = vcmask (!%p812_p7), 458112   ;;  %vm526_vm7 = vcmask (!%p812_p7), 523712   ;;  %vm567_vm8 = vcmask (!%p812_p7), 1041409  }
  0x43   : > { %v232_v16 = vld [vmem:[%s1184_s10 + $0x58] sm:$0xff]  ;;  %v287_v17 = vadd.f32 %v230_v13, %v229_v12  ;;  %v302_v19 = vadd.f32 %v286_v11, %v227_v8  ;;  %v233_v20 = vld [vmem:[%s1184_s10 + $0x60] sm:$0xff]  ;;  %v234_v21 = vld [vmem:[%s1184_s10 + $0x68] sm:$0xff]  ;;  %vm569_vm9 = vcmask (!%p812_p7), 523264   ;;  %vm648_vm10 = vcmask (!%p812_p7), 1043456  }
  0x44   : > { %v317_v18 = vadd.f32 %v301_v9, %v224_v6  ;;  %v235_v22 = vld [vmem:[%s1184_s10 + $0x70] sm:$0xff]  ;;  %v334_v23 = vld [vmem:[#allocation2 + $0x8] sm:$0xff]  ;;  %v288_v26 = vadd.f32 %v234_v21, %v233_v20  ;;  %v237_v27 = vld [vmem:[%s1184_s10 + $0x80] sm:$0xff]  ;;  %vm644_vm11 = vcmask (!%p812_p7), 31744   ;;  %vm728_vm12 = vcmask (!%p812_p7), 517120  }
  0x45   : > { %v303_v24 = vadd.f32 %v287_v17, %v231_v15  ;;  %v335_v25 = vld [vmem:[#allocation2 + $0x10] sm:$0xff]  ;;  %v318_v29 = vadd.f32 %v302_v19, %v228_v14  ;;  %v236_v30 = vld [vmem:[%s1184_s10 + $0x78] sm:$0xff]  ;;  %v238_v31 = vld [vmem:[%s1184_s10 + $0x88] sm:$0xff] }
  0x46   : > { %v349_v28 = vadd.f32 %v333_v10, %v317_v18  ;;  %v239_v32 = vld [vmem:[%s1184_s10 + $0x90] sm:$0xff]  ;;  %v304_v34 = vadd.f32 %v288_v26, %v235_v22  ;;  %v336_v35 = vld [vmem:[#allocation2 + $0x18] sm:$0xff]  ;;  %v289_v36 = vadd.f32 %v238_v31, %v237_v27  ;;  %v241_v37 = vld [vmem:[%s1184_s10 + $0xa0] sm:$0xff] }
  0x47   : > { %v319_v33 = vadd.f32 %v303_v24, %v232_v16  ;;  %v242_v38 = vld [vmem:[%s1184_s10 + $0xa8] sm:$0xff]  ;;  %v350_v39 = vadd.f32 %v334_v23, %v318_v29  ;;  %v240_v40 = vld [vmem:[%s1184_s10 + $0x98] sm:$0xff]  ;;  %v243_v41 = vld [vmem:[%s1184_s10 + $0xb0] sm:$0xff] }
  0x48   : > { %365 = vst [vmem:[#allocation2] sm:$0xff] %v349_v28  ;;  %v244_v42 = vld [vmem:[%s1184_s10 + $0xb8] sm:$0xff]  ;;  %v290_v43 = vadd.f32 %v242_v38, %v241_v37  ;;  %v320_v45 = vadd.f32 %v304_v34, %v236_v30  ;;  %v305_v46 = vadd.f32 %v289_v36, %v239_v32  ;;  %v245_v47 = vld [vmem:[%s1184_s10 + $0xc0] sm:$0xff]  ;;  %v246_v48 = vld [vmem:[%s1184_s10 + $0xc8] sm:$0xff] }
  0x49   : > { %v351_v44 = vadd.f32 %v335_v25, %v319_v33  ;;  %v247_v49 = vld [vmem:[%s1184_s10 + $0xd0] sm:$0xff]  ;;  %366 = vst [vmem:[#allocation2 + $0x8] sm:$0xff] %v350_v39  ;;  %v337_v50 = vld [vmem:[#allocation2 + $0x20] sm:$0xff]  ;;  %v338_v52 = vld [vmem:[#allocation2 + $0x28] sm:$0xff]  ;;  %v291_v53 = vadd.f32 %v246_v48, %v245_v47 }
  0x4a   : > { %v306_v51 = vadd.f32 %v290_v43, %v243_v41  ;;  %v249_v54 = vld [vmem:[%s1184_s10 + $0xe0] sm:$0xff]  ;;  %v352_v55 = vadd.f32 %v336_v35, %v320_v45  ;;  %v321_v56 = vadd.f32 %v305_v46, %v240_v40  ;;  %v248_v57 = vld [vmem:[%s1184_s10 + $0xd8] sm:$0xff]  ;;  %v250_v58 = vld [vmem:[%s1184_s10 + $0xe8] sm:$0xff] }
  0x4b   : > { %367 = vst [vmem:[#allocation2 + $0x10] sm:$0xff] %v351_v44  ;;  %v251_v59 = vld [vmem:[%s1184_s10 + $0xf0] sm:$0xff]  ;;  %v307_v61 = vadd.f32 %v291_v53, %v247_v49  ;;  %v292_v63 = vadd.f32 %v250_v58, %v249_v54  ;;  %v253_v0 = vld [vmem:[%s1184_s10 + $0x100] sm:$0xff]  ;;  %v254_v1 = vld [vmem:[%s1184_s10 + $0x108] sm:$0xff] }
  0x4c   : > { %v322_v60 = vadd.f32 %v306_v51, %v244_v42  ;;  %v339_v62 = vld [vmem:[#allocation2 + $0x30] sm:$0xff]  ;;  %368 = vst [vmem:[#allocation2 + $0x18] sm:$0xff] %v352_v55  ;;  %v353_v2 = vadd.f32 %v337_v50, %v321_v56  ;;  %v252_v3 = vld [vmem:[%s1184_s10 + $0xf8] sm:$0xff]  ;;  %v293_v6 = vadd.f32 %v254_v1, %v253_v0  ;;  %v257_v10 = vld [vmem:[%s1184_s10 + $0x120] sm:$0xff] }
  0x4d   : > { %v255_v4 = vld [vmem:[%s1184_s10 + $0x110] sm:$0xff]  ;;  %v256_v5 = vld [vmem:[%s1184_s10 + $0x118] sm:$0xff]  ;;  %v323_v8 = vadd.f32 %v307_v61, %v248_v57  ;;  %v308_v9 = vadd.f32 %v292_v63, %v251_v59  ;;  %v258_v11 = vld [vmem:[%s1184_s10 + $0x128] sm:$0xff] }
  0x4e   : > { %v354_v7 = vadd.f32 %v338_v52, %v322_v60  ;;  %v259_v12 = vld [vmem:[%s1184_s10 + $0x130] sm:$0xff]  ;;  %369 = vst [vmem:[#allocation2 + $0x20] sm:$0xff] %v353_v2  ;;  %v340_v13 = vld [vmem:[#allocation2 + $0x38] sm:$0xff]  ;;  %v309_v14 = vadd.f32 %v293_v6, %v255_v4  ;;  %v341_v15 = vld [vmem:[#allocation2 + $0x40] sm:$0xff]  ;;  %v294_v16 = vadd.f32 %v258_v11, %v257_v10 }
  0x4f   : > { %v261_v17 = vld [vmem:[%s1184_s10 + $0x140] sm:$0xff]  ;;  %v355_v18 = vadd.f32 %v339_v62, %v323_v8  ;;  %v324_v19 = vadd.f32 %v308_v9, %v252_v3  ;;  %v260_v20 = vld [vmem:[%s1184_s10 + $0x138] sm:$0xff]  ;;  %v262_v21 = vld [vmem:[%s1184_s10 + $0x148] sm:$0xff] }
  0x50   : > { %370 = vst [vmem:[#allocation2 + $0x28] sm:$0xff] %v354_v7  ;;  %v263_v22 = vld [vmem:[%s1184_s10 + $0x150] sm:$0xff]  ;;  %v325_v23 = vadd.f32 %v309_v14, %v256_v5  ;;  %v310_v24 = vadd.f32 %v294_v16, %v259_v12  ;;  %v342_v25 = vld [vmem:[#allocation2 + $0x48] sm:$0xff]  ;;  %v295_v26 = vadd.f32 %v262_v21, %v261_v17  ;;  %v265_v27 = vld [vmem:[%s1184_s10 + $0x160] sm:$0xff] }
  0x51   : > { %v266_v28 = vld [vmem:[%s1184_s10 + $0x168] sm:$0xff]  ;;  %371 = vst [vmem:[#allocation2 + $0x30] sm:$0xff] %v355_v18  ;;  %v356_v29 = vadd.f32 %v340_v13, %v324_v19  ;;  %v264_v30 = vld [vmem:[%s1184_s10 + $0x158] sm:$0xff]  ;;  %v267_v31 = vld [vmem:[%s1184_s10 + $0x170] sm:$0xff] }
  0x52   : > { %v268_v32 = vld [vmem:[%s1184_s10 + $0x178] sm:$0xff]  ;;  %v296_v33 = vadd.f32 %v266_v28, %v265_v27  ;;  %v357_v34 = vadd.f32 %v341_v15, %v325_v23  ;;  %v326_v35 = vadd.f32 %v310_v24, %v260_v20  ;;  %v311_v36 = vadd.f32 %v295_v26, %v263_v22  ;;  %v269_v37 = vld [vmem:[%s1184_s10 + $0x180] sm:$0xff]  ;;  %v270_v38 = vld [vmem:[%s1184_s10 + $0x188] sm:$0xff] }
  0x53   : > { %v271_v39 = vld [vmem:[%s1184_s10 + $0x190] sm:$0xff]  ;;  %372 = vst [vmem:[#allocation2 + $0x38] sm:$0xff] %v356_v29  ;;  %v344_v42 = vld [vmem:[#allocation2 + $0x58] sm:$0xff]  ;;  %v297_v43 = vadd.f32 %v270_v38, %v269_v37  ;;  %v273_v44 = vld [vmem:[%s1184_s10 + $0x1a0] sm:$0xff] }
  0x54   : > { %v343_v40 = vld [vmem:[#allocation2 + $0x50] sm:$0xff]  ;;  %v312_v41 = vadd.f32 %v296_v33, %v267_v31  ;;  %373 = vst [vmem:[#allocation2 + $0x40] sm:$0xff] %v357_v34  ;;  %v358_v45 = vadd.f32 %v342_v25, %v326_v35  ;;  %v327_v46 = vadd.f32 %v311_v36, %v264_v30  ;;  %v272_v47 = vld [vmem:[%s1184_s10 + $0x198] sm:$0xff]  ;;  %v274_v48 = vld [vmem:[%s1184_s10 + $0x1a8] sm:$0xff]  ;;  %v1059_v36 = vmov (!%p812_p7), 0.0|0.0  }
  0x55   : > { %v275_v49 = vld [vmem:[%s1184_s10 + $0x1b0] sm:$0xff]  ;;  %v313_v51 = vadd.f32 %v297_v43, %v271_v39  ;;  %v345_v52 = vld [vmem:[#allocation2 + $0x60] sm:$0xff]  ;;  %v298_v53 = vadd.f32 %v274_v48, %v273_v44  ;;  %v278_v55 = vld [vmem:[%s1184_s10 + $0x1c8] sm:$0xff]  ;;  %857 = vmatprep.subr.bf16.mxu0 (!%p812_p7), %v1059_v36 }
  0x56   : > { %v328_v50 = vadd.f32 %v312_v41, %v268_v32  ;;  %v277_v54 = vld [vmem:[%s1184_s10 + $0x1c0] sm:$0xff]  ;;  %374 = vst [vmem:[#allocation2 + $0x48] sm:$0xff] %v358_v45  ;;  %v359_v56 = vadd.f32 %v343_v40, %v327_v46  ;;  %v276_v57 = vld [vmem:[%s1184_s10 + $0x1b8] sm:$0xff]  ;;  %v279_v58 = vld [vmem:[%s1184_s10 + $0x1d0] sm:$0xff]  ;;  %v1061_v46 = vmov (!%p812_p7), 0.0  }
  0x57   : > { %v280_v59 = vld [vmem:[%s1184_s10 + $0x1d8] sm:$0xff]  ;;  %v299_v60 = vadd.f32 %v278_v55, %v277_v54  ;;  %v329_v62 = vadd.f32 %v313_v51, %v272_v47  ;;  %v314_v63 = vadd.f32 %v298_v53, %v275_v49  ;;  %v281_v0 = vld [vmem:[%s1184_s10 + $0x1e0] sm:$0xff]  ;;  %v282_v1 = vld [vmem:[%s1184_s10 + $0x1e8] sm:$0xff]  ;;  %849 = vmatprep.mubr.msk.f32.mxu0 (!%p812_p7), %vm1060_vm0, %v1061_v46  ;;  %852 = vmatprep.subr.mxu1 (!%p812_p7), %v1061_v46  ;;  %v473_v51 = vlaneseq (!%p812_p7) }
  0x58   : > { %v360_v61 = vadd.f32 %v344_v42, %v328_v50  ;;  %v283_v2 = vld [vmem:[%s1184_s10 + $0x1f0] sm:$0xff]  ;;  %375 = vst [vmem:[#allocation2 + $0x50] sm:$0xff] %v359_v56  ;;  %v346_v3 = vld [vmem:[#allocation2 + $0x68] sm:$0xff]  ;;  %v300_v5 = vadd.f32 %v282_v1, %v281_v0  ;;  %v284_v9 = vld [vmem:[%s1184_s10 + $0x1f8] sm:$0xff]  ;;  %854 = vmatprep.mubr.msk.f32.mxu1 (!%p812_p7), %vm1060_vm0, %v1061_v46 }
  0x59   : > { %v315_v4 = vadd.f32 %v299_v60, %v279_v58  ;;  %v361_v6 = vadd.f32 %v345_v52, %v329_v62  ;;  %v330_v7 = vadd.f32 %v314_v63, %v276_v57  ;;  %v347_v8 = vld [vmem:[#allocation2 + $0x70] sm:$0xff]  ;;  %v348_v13 = vld [vmem:[#allocation2 + $0x78] sm:$0xff]  ;;  %v385_v18 = vld [vmem:[#allocation2] sm:$0xff] (!%p812_p7)  ;;  %v474_v54 = vand.u32 (!%p812_p7), 127, %v473_v51 }
  0x5a   : > { %376 = vst [vmem:[#allocation2 + $0x58] sm:$0xff] %v360_v61  ;;  %v316_v11 = vadd.f32 %v300_v5, %v283_v2  ;;  %384 = sbr.rel (%p812_p7) target bundleno = 721 (0x2d1), region = 44  ;;  %401 = vadd.xlane.f32.xlu0 (!%p812_p7), %v385_v18  ;;  %v386_v20 = vld [vmem:[#allocation2 + $0x8] sm:$0xff] (!%p812_p7)  ;;  %v387_v22 = vld [vmem:[#allocation2 + $0x10] sm:$0xff] (!%p812_p7)  ;;  %v388_v24 = vld [vmem:[#allocation2 + $0x18] sm:$0xff] (!%p812_p7)  ;;  %v476_v55 = vshrl.u32 (!%p812_p7), %v473_v51, 7 }
  0x5b   : > { %v331_v10 = vadd.f32 %v315_v4, %v280_v59  ;;  %377 = vst [vmem:[#allocation2 + $0x60] sm:$0xff] %v361_v6  ;;  %v362_v12 = vadd.f32 %v346_v3, %v330_v7  ;;  %v393_v17 = vld [vmem:[#allocation2 + $0x40] sm:$0xff] (!%p812_p7)  ;;  %v390_v28 = vld [vmem:[#allocation2 + $0x28] sm:$0xff] (!%p812_p7)  ;;  %v391_v30 = vld [vmem:[#allocation2 + $0x30] sm:$0xff] (!%p812_p7)  ;;  %v479_v58 = vadd.s32 (!%p812_p7), 4294967288, %v474_v54  ;;  %v486_v59 = vadd.s32 (!%p812_p7), 4294967280, %v474_v54 }
  0x5c   : > { %v332_v15 = vadd.f32 %v316_v11, %v284_v9  ;;  %417 = vadd.xlane.f32.xlu1 (!%p812_p7), %v393_v17  ;;  %v389_v26 = vld [vmem:[#allocation2 + $0x20] sm:$0xff] (!%p812_p7)  ;;  %v392_v32 = vld [vmem:[#allocation2 + $0x38] sm:$0xff] (!%p812_p7)  ;;  %v450_v34 = vld [vmem:[%s1342_s1 + $0x8] sm:$0xff] (!%p812_p7)  ;;  %v493_v60 = vadd.s32 (!%p812_p7), 4294967272, %v474_v54  ;;  %v500_v61 = vadd.s32 (!%p812_p7), 4294967264, %v474_v54  ;;  %v477_v62 = vsub.s32 (!%p812_p7), %v474_v54, %v476_v55 }
  0x5d   : > { %v363_v14 = vadd.f32 %v347_v8, %v331_v10  ;;  %378 = vst [vmem:[#allocation2 + $0x68] sm:$0xff] %v362_v12  ;;  %v394_v19 = vld [vmem:[#allocation2 + $0x48] sm:$0xff] (!%p812_p7)  ;;  %v449_v33 = vld [vmem:[%s1342_s1] sm:$0xff] (!%p812_p7)  ;;  %v451_v37 = vld [vmem:[%s1342_s1 + $0x10] sm:$0xff] (!%p812_p7)  ;;  %v482_v1 = vsub.s32 (!%p812_p7), %v479_v58, %v476_v55  ;;  %v489_v2 = vsub.s32 (!%p812_p7), %v486_v59, %v476_v55  ;;  %v507_v3 = vadd.s32 (!%p812_p7), 4294967256, %v474_v54 }
  0x5e   : > { %v364_v16 = vadd.f32 %v348_v13, %v332_v15  ;;  %403 = vadd.xlane.f32.xlu0 (!%p812_p7), %v386_v20  ;;  %v858_v35 = vpack.c.bf16 (!%p812_p7), %v450_v34, %v449_v33  ;;  %v452_v38 = vld [vmem:[%s1342_s1 + $0x18] sm:$0xff] (!%p812_p7)  ;;  %v453_v40 = vld [vmem:[%s1342_s1 + $0x20] sm:$0xff] (!%p812_p7)  ;;  %v454_v41 = vld [vmem:[%s1342_s1 + $0x28] sm:$0xff] (!%p812_p7)  ;;  %v496_v4 = vsub.s32 (!%p812_p7), %v493_v60, %v476_v55  ;;  %v514_v5 = vadd.s32 (!%p812_p7), 4294967248, %v474_v54 }
  0x5f   : > { %379 = vst [vmem:[#allocation2 + $0x70] sm:$0xff] %v363_v14  ;;  %v395_v21 = vld [vmem:[#allocation2 + $0x50] sm:$0xff] (!%p812_p7)  ;;  %v861_v39 = vpack.c.bf16 (!%p812_p7), %v452_v38, %v451_v37  ;;  %v864_v42 = vpack.c.bf16 (!%p812_p7), %v454_v41, %v453_v40  ;;  %v456_v44 = vld [vmem:[%s1342_s1 + $0x38] sm:$0xff] (!%p812_p7)  ;;  %v503_v8 = vsub.s32 (!%p812_p7), %v500_v61, %v476_v55  ;;  %v510_v17 = vsub.s32 (!%p812_p7), %v507_v3, %v476_v55 }
  0x60   : > { %380 = vst [vmem:[#allocation2 + $0x78] sm:$0xff] %v364_v16  ;;  %419 = vadd.xlane.f32.xlu1 (!%p812_p7), %v394_v19  ;;  %859 = vmatpush3.bf16.msra.mxu0 (!%p812_p7), %v858_v35  ;;  %v455_v43 = vld [vmem:[%s1342_s1 + $0x30] sm:$0xff] (!%p812_p7)  ;;  %v517_v20 = vsub.s32 (!%p812_p7), %v514_v5, %v476_v55 }
  0x61   : > { %v396_v23 = vld [vmem:[#allocation2 + $0x58] sm:$0xff]  ;;  %860 = vmatprep.subr.bf16.mxu0 %v1059_v36  ;;  %v867_v45 = vpack.c.bf16 %v456_v44, %v455_v43 }
  0x62   : > { %405 = vadd.xlane.f32.xlu0 %v387_v22  ;;  %v397_v25 = vld [vmem:[#allocation2 + $0x60] sm:$0xff] }
  0x64   : > { %421 = vadd.xlane.f32.xlu1 %v395_v21  ;;  %v398_v27 = vld [vmem:[#allocation2 + $0x68] sm:$0xff]  ;;  %862 = vmatpush3.bf16.msra.mxu0 %v861_v39  ;;  %v521_v21 = vadd.s32 4294967240, %v474_v54 }
  0x65   : > { %863 = vmatprep.subr.bf16.mxu0 %v1059_v36 }
  0x66   : > { %407 = vadd.xlane.f32.xlu0 %v388_v24  ;;  %v399_v29 = vld [vmem:[#allocation2 + $0x70] sm:$0xff]  ;;  %v524_v38 = vsub.s32 %v521_v21, %v476_v55 }
  0x67   : > { %v400_v31 = vld [vmem:[#allocation2 + $0x78] sm:$0xff] }
  0x68   : > { %423 = vadd.xlane.f32.xlu1 %v396_v23  ;;  %865 = vmatpush3.bf16.msra.mxu0 %v864_v42 }
  0x69   : > { %866 = vmatprep.subr.bf16.mxu0 %v1059_v36 }
  0x6a   : > { %409 = vadd.xlane.f32.xlu0 %v389_v26 }
  0x6c   : > { %425 = vadd.xlane.f32.xlu1 %v397_v25  ;;  %868 = vmatpush3.bf16.msra.mxu0 %v867_v45 }
  0x6e   : > { %411 = vadd.xlane.f32.xlu0 %v390_v28 }
  0x70   : > { %427 = vadd.xlane.f32.xlu1 %v398_v27 }
  0x72   : > { %413 = vadd.xlane.f32.xlu0 %v391_v30 }
  0x74   : > { %429 = vadd.xlane.f32.xlu1 %v399_v29 }
  0x76   : > { %415 = vadd.xlane.f32.xlu0 %v392_v32 }
  0x78   : > { %431 = vadd.xlane.f32.xlu1 %v400_v31 }
  0xe7   : > { %v402_v48 = vpop.xlane.xlu0 %401 }
  0xe8   : > { %v433_v10 = vmul.f32 0.0009765625, %v402_v48 }
  0xe9   : > { %v418_v47 = vpop.xlane.xlu1 %417 }
  0xea   : > { %v441_v9 = vmul.f32 0.0009765625, %v418_v47  ;;  %v478_v27 = vrot.slane %v433_v10, %v477_v62 }
  0xeb   : > { %v404_v50 = vpop.xlane.xlu0 %403 }
  0xec   : > { %v434_v7 = vmul.f32 0.0009765625, %v404_v50  ;;  %v531_v26 = vrot.slane %v441_v9, %v477_v62 }
  0xed   : > { %v420_v49 = vpop.xlane.xlu1 %419 }
  0xee   : > { %v442_v6 = vmul.f32 0.0009765625, %v420_v49  ;;  %v483_v23 = vrot.slane %v434_v7, %v482_v1 }
  0xef   : > { %v406_v53 = vpop.xlane.xlu0 %405 }
  0xf0   : > { %v435_v12 = vmul.f32 0.0009765625, %v406_v53  ;;  %v535_v22 = vrot.slane %v442_v6, %v482_v1  ;;  %v485_v40 = vsel %vm484_vm1, %v483_v23, %v478_v27 }
  0xf1   : > { %v422_v52 = vpop.xlane.xlu1 %421 }
  0xf2   : > { %v443_v11 = vmul.f32 0.0009765625, %v422_v52  ;;  %v490_v29 = vrot.slane %v435_v12, %v489_v2  ;;  %v536_v39 = vsel %vm484_vm1, %v535_v22, %v531_v26 }
  0xf3   : > { %v408_v57 = vpop.xlane.xlu0 %407 }
  0xf4   : > { %v436_v16 = vmul.f32 0.0009765625, %v408_v57  ;;  %v540_v28 = vrot.slane %v443_v11, %v489_v2  ;;  %v492_v44 = vsel %vm491_vm2, %v490_v29, %v485_v40 }
  0xf5   : > { %v424_v56 = vpop.xlane.xlu1 %423 }
  0xf6   : > { %v444_v15 = vmul.f32 0.0009765625, %v424_v56  ;;  %v497_v33 = vrot.slane %v436_v16, %v496_v4  ;;  %v541_v43 = vsel %vm491_vm2, %v540_v28, %v536_v39 }
  0xf7   : > { %v410_v0 = vpop.xlane.xlu0 %409 }
  0xf8   : > { %v437_v19 = vmul.f32 0.0009765625, %v410_v0  ;;  %v545_v32 = vrot.slane %v444_v15, %v496_v4  ;;  %v499_v50 = vsel %vm498_vm3, %v497_v33, %v492_v44  ;;  %v643_v0 = vld [vmem:[%s1343_s2] sm:$0xf] }
  0xf9   : > { %v426_v63 = vpop.xlane.xlu1 %425  ;;  %853 = vmatpush3.msk.msra.mxu1 %vm648_vm10, %v643_v0 }
  0xfa   : > { %v445_v18 = vmul.f32 0.0009765625, %v426_v63  ;;  %v504_v37 = vrot.slane %v437_v19, %v503_v8  ;;  %v546_v49 = vsel %vm498_vm3, %v545_v32, %v541_v43 }
  0xfb   : > { %v412_v14 = vpop.xlane.xlu0 %411 }
  0xfc   : > { %v438_v25 = vmul.f32 0.0009765625, %v412_v14  ;;  %v550_v36 = vrot.slane %v445_v18, %v503_v8  ;;  %v506_v54 = vsel %vm505_vm4, %v504_v37, %v499_v50 }
  0xfd   : > { %v428_v13 = vpop.xlane.xlu1 %427 }
  0xfe   : > { %v446_v24 = vmul.f32 0.0009765625, %v428_v13  ;;  %v511_v42 = vrot.slane %v438_v25, %v510_v17  ;;  %v551_v53 = vsel %vm505_vm4, %v550_v36, %v546_v49 }
  0xff   : > { %v414_v31 = vpop.xlane.xlu0 %413 }
 0x100   : > { %v439_v35 = vmul.f32 0.0009765625, %v414_v31  ;;  %v555_v41 = vrot.slane %v446_v24, %v510_v17  ;;  %v513_v56 = vsel %vm512_vm5, %v511_v42, %v506_v54 }
 0x101   : > { %v430_v30 = vpop.xlane.xlu1 %429 }
 0x102   : > { %v447_v34 = vmul.f32 0.0009765625, %v430_v30  ;;  %v518_v46 = vrot.slane %v439_v35, %v517_v20  ;;  %v556_v55 = vsel %vm512_vm5, %v555_v41, %v551_v53 }
 0x103   : > { %v416_v48 = vpop.xlane.xlu0 %415 }
 0x104   : > { %v560_v45 = vrot.slane %v447_v34, %v517_v20  ;;  %v440_v52 = vmul.f32 0.0009765625, %v416_v48  ;;  %v520_v60 = vsel %vm519_vm6, %v518_v46, %v513_v56 }
 0x105   : > { %v432_v47 = vpop.xlane.xlu1 %431 }
 0x106   : > { %v448_v51 = vmul.f32 0.0009765625, %v432_v47  ;;  %v525_v58 = vrot.slane %v440_v52, %v524_v38  ;;  %v561_v59 = vsel %vm519_vm6, %v560_v45, %v556_v55 }
 0x108   : > { %v565_v57 = vrot.slane %v448_v51, %v524_v38  ;;  %v527_v61 = vsel %vm526_vm7, %v525_v58, %v520_v60 }
 0x10a   : > { %v566_v62 = vsel %vm526_vm7, %v565_v57, %v561_v59 }
 0x10b   : > { %v568_v63 = vsel %vm567_vm8, %v566_v62, %v527_v61 }
 0x10c   : > { %850 = vmatmul.mubr.msk.f32.vlgmr.msra.gmra.mrb[0].mxu0 %vm569_vm9, %v568_v63 }
 0x1df   : > { %v638_v1 = vpop.f32.mrb[0].mxu0 }
 0x1e0   : > { %v642_v2 = vmax.f32 %v638_v1, 0.0  ;;  %v851_v3 = vpop.f32.mrb[1].mxu0 }
 0x1e2   : > { %855 = vmatmul.mubr.msk.f32.vlgmr.msra.gmra.mrb[0].mxu1 %vm644_vm11, %v642_v2 }
 0x2b5   : > { %v718_v4 = vpop.f32.mrb[0].mxu1 }
 0x2b6   : > { %v816_v5 = vmul.f32 -1.442695, %v718_v4  ;;  %v856_v6 = vpop.f32.mrb[1].mxu1 }
 0x2b8   : > { %938 = vpow2.f32 %v816_v5 }
 0x2c2   : > { %v939_v7 = vpop.eup %938 }
 0x2c3   : > { %v725_v8 = vadd.f32 1.0, %v939_v7 }
 0x2c5   : > { %940 = vrcp.f32 %v725_v8 }
 0x2cf   : > { %v941_v9 = vpop.eup %940 }
 0x2d0   : > { %729 = vst.msk [vmem:[#allocation6] sm:$0x3] %vm728_vm12, %v941_v9 }
 0x2d1 PF: > { %p1297_p9 = scmp.eq.s32.totalorder %s803_s18, 1  ;;  %s1062_s10 = smov [#allocation6]  }
 0x2d2   : > { %s739_s15 = sshll.u32 %s1062_s10, 4  ;;  %s740_s15 = int_to_ptr.vmem [resolvable:$true] %s739_s15 }
 0x2d3   : > { %s972_s23 = scalar_lea.vmem %s740_s15, 32  ;;  %p979_p11 = scmp.lt.s32.totalorder %s740_s15, %s740_s15 }
 0x2d4   : > { %p973_p5 = scmp.ne.s32.totalorder %s740_s15, %s972_s23  ;;  %p980_p13 = scmp.lt.s32.totalorder %s972_s23, %s972_s23 }
 0x2d6   : > { %p974_p6 = pnand %p973_p5, %p1297_p9  ;;  %p981_p1 = por %p980_p13, %p979_p11 }
 0x2d8   : > { %p975_p8 = pneg %p974_p6 }
 0x2da   : > { %p982_p2 = pnand %p981_p1, %p975_p8 }
 0x2dc   : > { %985 = shalt.err (!%p982_p2)
}
 0x2dd   : > { %s986_s18 = scalar_lea.hbm %s1344_s3, 32 }
 0x2de   : > { %p987_p3 = scmp.ne.s32.totalorder %s1344_s3, %s986_s18  ;;  %p992_p4 = scmp.lt.u32.totalorder %s986_s18, %s1344_s3 }
 0x2e0   : > { %p988_p12 = pnand %p987_p3, %p1297_p9 }
 0x2e2   : > { %p989_p0 = pneg %p988_p12 }
 0x2e4   : > { %p994_p10 = pnand %p992_p4, %p989_p0 }
 0x2e6   : > { %997 = shalt.err (!%p994_p10)
}
 0x2e7   : > { %872 = dma.vmem_to_hbm [thread:$0]  (%p1297_p9), %s740_s15, 32, %s1344_s3, [#allocation5]  }
 0x2e8   : > { %1027 = dma.done.wait (%p1297_p9), [#allocation5], 32  }
 0x2e9   : > { %1029 = vsyncadd (%p1297_p9), [#allocation5], 4294967264 }
 0x2ea PF: > { %s17_s17 = sadd.s32 1, %s1052_s17   ;;  %s1350_s12 = smov %s1036_s13 }
 0x2eb   : > { %p14_p7 = scmp.ge.s32.totalorder %s17_s17, 4   ;;  %s1351_s13 = smov %s1040_s14 }
 0x2ec   : > { %s1352_s14 = smov %s1134_s24  ;;  %s1353_s15 = smov %s1048_s16 }
 0x2ed   : > { %s1354_s16 = smov %s1356_s19  ;;  %16 = sbr.rel (!%p14_p7) target bundleno = 5 (0x5), region = 78 }
 0x2f4   :  { %752 = vsyncpa [#allocation4], 1 }
 0x2f5   :  { %754 = vsyncpa [#allocation4 + $0x1], 1 }
 0x2f6   :  { %755 = vsyncpa [#allocation5], 1 }
 0x2f7   :  { %757 = vsyncpa [#allocation5 + $0x1], 1 }

</bundles_post_ra>
